<compile_context>
chip_gen: v6e
topology: v6e:2x2x1
jax: 0.10.0
libtpu: 0.0.40
codegen_flags: <defaults>
</compile_context>

<pallas_src>
import jax
import jax.numpy as jnp
from jax import lax
from jax.experimental import pallas as pl
from jax.experimental.pallas import tpu as pltpu


def _round_up(x: int, m: int) -> int:
    return ((x + m - 1) // m) * m


def _choose_tile(dim: int, cap: int, align: int):
    """Pick a tile size for `dim`.

    Returns (tile, padded_dim). Preference order:
      1. the full dim if it fits under `cap` (no padding, full-dim blocks are
         always legal w.r.t. the (8,128) rule),
      2. the largest multiple of `align` <= cap that divides dim (no padding),
      3. `cap` rounded to `align`, with padding (fallback only).
    """
    if dim <= cap:
        return dim, dim
    cap = max((cap // align) * align, align)
    t = cap
    while t >= align:
        if dim % t == 0:
            return t, dim
        t -= align
    return cap, _round_up(dim, cap)


# x_tile: (K, M) -- native channel-major layout; w_tile: (K, E).
_CONTRACT_LHS0_RHS0 = (((0,), (0,)), ((), ()))


def _linear_mlp_kernel_single_k(x_ref, w_ref, b_ref, o_ref):
    # x_ref: (tk, tm)   K x M slice of x in its native (C, N) layout
    # w_ref: (tk, tn)   K x E slice of the transposed weight
    # b_ref: (1,  tn)   f32 bias slice
    # o_ref: (tm, tn)
    acc = lax.dot_general(
        x_ref[...],
        w_ref[...],
        dimension_numbers=_CONTRACT_LHS0_RHS0,
        preferred_element_type=jnp.float32,
    )
    o_ref[...] = (acc + b_ref[...]).astype(o_ref.dtype)


def _linear_mlp_kernel_multi_k(x_ref, w_ref, b_ref, o_ref, acc_ref):
    k = pl.program_id(3)
    part = lax.dot_general(
        x_ref[...],
        w_ref[...],
        dimension_numbers=_CONTRACT_LHS0_RHS0,
        preferred_element_type=jnp.float32,
    )

    @pl.when(k == 0)
    def _():
        acc_ref[...] = part          # direct store: no zero-fill pass

    @pl.when(k > 0)
    def _():
        acc_ref[...] += part

    @pl.when(k == pl.num_programs(3) - 1)
    def _():
        o_ref[...] = (acc_ref[...] + b_ref[...]).astype(o_ref.dtype)


def linear_mlp(
    x: jax.Array,
    weight: jax.Array,
    bias: jax.Array,
    *,
    tm_cap: int = 512,
    tk_cap: int = 512,
    tn_cap: int = 1024,
) -> jax.Array:
    """x: (B, C, H, W); weight: (E, C) [PyTorch Linear layout]; bias: (E,).

    Returns (B, H*W, E) == Linear(x.flatten(2).transpose(1, 2)).
    """
    B, C, H, W = x.shape
    E, K = weight.shape
    assert K == C, "weight in_features must match channel dim"
    N = H * W
    out_dtype = x.dtype

    # Free reshape only -- no transpose of the activation.
    x3 = x.reshape(B, K, N)                       # (B, K, N)
    w = weight.T                                  # (K, E) -- tiny, weight only
    b = bias.astype(jnp.float32).reshape(1, E)    # f32 bias for the f32 epilogue

    # Tile choice (full-dim tiles when possible; padding only as fallback).
    tk, Kp = _choose_tile(K, tk_cap, 8)      # sublane dim of x & w blocks
    tm, Np = _choose_tile(N, tm_cap, 128)    # lane dim of x block / rows of out
    tn, Ep = _choose_tile(E, tn_cap, 128)    # lane dim of w / out blocks

    # v7x megacore: if the batch axis alone cannot feed 2 TensorCores, split M.
    if B == 1 and Np // tm < 2 and Np % 256 == 0:
        tm = Np // 2

    if (Kp, Np) != (K, N):
        x3 = jnp.pad(x3, ((0, 0), (0, Kp - K), (0, Np - N)))
    if (Kp, Ep) != (K, E):
        w = jnp.pad(w, ((0, Kp - K), (0, Ep - E)))
    if Ep != E:
        b = jnp.pad(b, ((0, 0), (0, Ep - E)))

    num_k = Kp // tk
    grid = (B, Np // tm, Ep // tn, num_k)

    if num_k == 1:
        kernel = _linear_mlp_kernel_single_k
        scratch_shapes = ()
    else:
        kernel = _linear_mlp_kernel_multi_k
        scratch_shapes = (pltpu.VMEM((tm, tn), jnp.float32),)

    # VMEM budget: double-buffered tiles (+ f32 accumulator if multi-K).
    elt = jnp.dtype(out_dtype).itemsize
    vmem_bytes = 2 * (
        tk * tm * x3.dtype.itemsize
        + tk * tn * w.dtype.itemsize
        + tn * 4
        + tm * tn * elt
    )
    if num_k > 1:
        vmem_bytes += tm * tn * 4
    vmem_limit = min(max(int(1.5 * vmem_bytes), 32 << 20), 48 << 20)

    cost = pl.CostEstimate(
        flops=2 * B * N * K * E,
        transcendentals=0,
        bytes_accessed=(
            x3.size * x3.dtype.itemsize
            + w.size * w.dtype.itemsize
            + b.size * b.dtype.itemsize
            + B * Np * Ep * elt
        ),
    )

    out = pl.pallas_call(
        kernel,
        out_shape=jax.ShapeDtypeStruct((B, Np, Ep), out_dtype),
        grid_spec=pltpu.PrefetchScalarGridSpec(
            num_scalar_prefetch=0,
            grid=grid,
            in_specs=[
                # x in native (B, K, N) layout: batch squeezed, (K-tile, M-tile).
                pl.BlockSpec((None, tk, tm), lambda bb, i, j, k: (bb, k, i)),
                # transposed weight (K, E): (K-tile, E-tile).
                pl.BlockSpec((tk, tn), lambda bb, i, j, k: (k, j)),
                # bias (1, E): current E-tile.
                pl.BlockSpec((1, tn), lambda bb, i, j, k: (0, j)),
            ],
            out_specs=pl.BlockSpec((None, tm, tn), lambda bb, i, j, k: (bb, i, j)),
            scratch_shapes=scratch_shapes,
        ),
        compiler_params=pltpu.CompilerParams(
            dimension_semantics=("parallel", "parallel", "parallel", "arbitrary"),
            vmem_limit_bytes=vmem_limit,
        ),
        cost_estimate=cost,
    )(x3, w, b)

    # Strip fallback padding (no-op for aligned Segformer shapes).
    if (Np, Ep) != (N, E):
        out = out[:, :N, :E]
    return out


if __name__ == "__main__":
    # Small shapes consistent with the module: batch=2, channels(input_dim)=32,
    # spatial 8x8 (-> 64 patches), embed_dim=32.
    B, C, H, W = 2, 32, 8, 8
    E = 32

    key = jax.random.PRNGKey(0)
    k_x, k_w, k_b = jax.random.split(key, 3)

    x = jax.random.normal(k_x, (B, C, H, W), dtype=jnp.float32)
    weight = jax.random.normal(k_w, (E, C), dtype=jnp.float32) * 0.05  # (out, in)
    bias = jax.random.normal(k_b, (E,), dtype=jnp.float32) * 0.05

    out = jax.block_until_ready(linear_mlp(x, weight, bias))

    # Reference: pure-JAX flatten(2).transpose(1, 2) then Linear.
    x_flat = jnp.transpose(x.reshape(B, C, H * W), (0, 2, 1))   # (B, N, C)
    ref = jnp.einsum("bnc,ec->bne", x_flat, weight) + bias      # (B, N, E)

    assert out.shape == (B, H * W, E), f"bad shape {out.shape}"
    assert jnp.allclose(out, ref, atol=1e-2, rtol=1e-2), "mismatch vs reference"

    print("KERNEL_OK")
</pallas_src>

<mosaic_0001>
module attributes {stable_mosaic.version = 11 : i64} {
  func.func @_linear_mlp_kernel_single_k(%arg0: i32, %arg1: i32, %arg2: i32, %arg3: i32, %arg4: memref<1x32x64xf32, #tpu.memory_space<vmem>>, %arg5: memref<32x32xf32, #tpu.memory_space<vmem>>, %arg6: memref<1x32xf32, #tpu.memory_space<vmem>>, %arg7: memref<1x64x32xf32, #tpu.memory_space<vmem>>) attributes {dimension_semantics = [#tpu.dimension_semantics<parallel>, #tpu.dimension_semantics<parallel>, #tpu.dimension_semantics<parallel>, #tpu.dimension_semantics<arbitrary>], iteration_bounds = array<i64: 2, 1, 1, 1>, scalar_prefetch = 0 : i64, scratch_operands = 0 : i64, tpu.core_type = #tpu.core_type<tc>, window_params = [{transform_indices = @transform_0, window_bounds = array<i64: 1, 32, 64>}, {transform_indices = @transform_1, window_bounds = array<i64: 32, 32>}, {transform_indices = @transform_2, window_bounds = array<i64: 1, 32>}, {transform_indices = @transform_3, window_bounds = array<i64: 1, 64, 32>}]} {
    %c0 = arith.constant 0 : index
    %c0_0 = arith.constant 0 : index
    %c0_1 = arith.constant 0 : index
    %0 = vector.load %arg4[%c0, %c0_0, %c0_1] : memref<1x32x64xf32, #tpu.memory_space<vmem>>, vector<1x32x64xf32>
    %1 = vector.shape_cast %0 : vector<1x32x64xf32> to vector<32x64xf32>
    %c0_2 = arith.constant 0 : index
    %c0_3 = arith.constant 0 : index
    %2 = vector.load %arg5[%c0_2, %c0_3] : memref<32x32xf32, #tpu.memory_space<vmem>>, vector<32x32xf32>
    %cst = arith.constant dense<0.000000e+00> : vector<64x32xf32>
    %3 = tpu.matmul %1, %2, %cst {dimension_numbers = #tpu.dot_dimension_numbers<[0], [0], [1], [1], [0, 1, 1, 1], [], []>} : vector<32x64xf32>, vector<32x32xf32>, vector<64x32xf32> -> vector<64x32xf32>
    %c0_4 = arith.constant 0 : index
    %c0_5 = arith.constant 0 : index
    %4 = vector.load %arg6[%c0_4, %c0_5] : memref<1x32xf32, #tpu.memory_space<vmem>>, vector<1x32xf32>
    %5 = vector.broadcast %4 : vector<1x32xf32> to vector<64x32xf32>
    %6 = arith.addf %3, %5 : vector<64x32xf32>
    %c0_6 = arith.constant 0 : index
    %c0_7 = arith.constant 0 : index
    %c0_8 = arith.constant 0 : index
    %7 = vector.load %arg7[%c0_6, %c0_7, %c0_8] : memref<1x64x32xf32, #tpu.memory_space<vmem>>, vector<1x64x32xf32>
    %8 = vector.shape_cast %7 : vector<1x64x32xf32> to vector<64x32xf32>
    %9 = vector.shape_cast %6 : vector<64x32xf32> to vector<1x64x32xf32>
    tpu.vector_store %arg7[%c0_6, %c0_7, %c0_8], %9 {strides = array<i32>} : memref<1x64x32xf32, #tpu.memory_space<vmem>>, vector<1x64x32xf32>,
    return
  }
  func.func @transform_0(%arg0: i32, %arg1: i32, %arg2: i32, %arg3: i32) -> (i32, i32, i32) {
    %c0_i32 = arith.constant 0 : i32
    return %arg0, %arg3, %arg1 : i32, i32, i32
  }
  func.func @transform_1(%arg0: i32, %arg1: i32, %arg2: i32, %arg3: i32) -> (i32, i32) {
    %c0_i32 = arith.constant 0 : i32
    return %arg3, %arg2 : i32, i32
  }
  func.func @transform_2(%arg0: i32, %arg1: i32, %arg2: i32, %arg3: i32) -> (i32, i32) {
    %c0_i32 = arith.constant 0 : i32
    %c0_i32_0 = arith.constant 0 : i32
    return %c0_i32, %arg2 : i32, i32
  }
  func.func @transform_3(%arg0: i32, %arg1: i32, %arg2: i32, %arg3: i32) -> (i32, i32, i32) {
    %c0_i32 = arith.constant 0 : i32
    return %arg0, %arg1, %arg2 : i32, i32, i32
  }
}

</mosaic_0001>

<bundles_post_ra>
// kernel: tpu_custom_call.1
= control target key start
LH: loop header
LB: loop body
LE: loop exit
PB: predicated region body
PF: predicated region fallthrough
CT: control target
= control target key end

     0   :  { %8 = vsyncpa [#allocation3], 0  ;;  %s1024_s0 = inlined_call_operand.hbm [shape: f32[2,32,64], index: 0, kind: input, shape index: {}]   ;;  %s1025_s1 = inlined_call_operand.hbm [shape: f32[32,32], index: 1, kind: input, shape index: {}]   ;;  %s1026_s2 = inlined_call_operand.vmem [shape: f32[1,32], index: 2, kind: input, shape index: {}]   ;;  %s1027_s3 = inlined_call_operand.vmem [shape: f32[2,64,32], index: 3, kind: output, shape index: {}]  }
   0x1   :  { %10 = vsyncpa [#allocation3 + $0x1], 0 }
   0x2   :  { %11 = vsyncpa [#allocation5], 0  ;;  %s878_s12 = smov 0   ;;  %s880_s13 = smov 0  }
   0x3   :  { %s882_s14 = smov 0   ;;  %s884_s15 = smov 0  }
   0x4   :  { %s886_s16 = smov 0   ;;  %s888_s17 = smov 0  }
   0x5 LB: > { %s608_s18 = sadd.s32 4294967295, %s852_s17   ;;  %p67_p0 = scmp.ne.s32.totalorder %s836_s13, %s832_s12  ;;  %s852_s17 = sphi %s888_s17, %s17_s17   ;;  %s848_s16 = sphi %s886_s16, %s1037_s16   ;;  %s844_s15 = sphi %s884_s15, %s1036_s15   ;;  %s840_s14 = sphi %s882_s14, %s1035_s14   ;;  %s836_s13 = sphi %s880_s13, %s1034_s13   ;;  %s832_s12 = sphi %s878_s12, %s1033_s12  }
   0x6   : > { %p908_p1 = scmp.eq.s32.totalorder %s608_s18, 0  ;;  %p610_p2 = scmp.ge.s32.totalorder %s852_s17, 1 }
   0x7   : > { %p162_p3 = scmp.lt.s32.totalorder %s852_s17, 3  ;;  %s854_s22 = smov [#allocation4]  }
   0x8   : > { %p916_p4 = por %p908_p1, %p67_p0  ;;  %s178_s23 = sshll.u32 %s854_s22, 4  ;;  %s179_s23 = int_to_ptr.vmem [resolvable:$true] %s178_s23 }
   0x9   : > { %p920_p5 = pnand %p610_p2, %p162_p3  ;;  %s43_s25 = sadd.s32 1, %s848_s16 }
   0xa   : > { %s755_s26 = scalar_lea.vmem %s179_s23, 512  ;;  %p763_p12 = scmp.lt.s32.totalorder %s179_s23, %s179_s23 }
   0xb   : > { %p681_p6 = pneg %p920_p5  ;;  %p756_p9 = scmp.ne.s32.totalorder %s179_s23, %s755_s26 }
   0xc   : > { %p764_p13 = scmp.lt.s32.totalorder %s755_s26, %s755_s26 }
   0xd   : > { %p928_p7 = pnand %p681_p6, %p908_p1 }
   0xe   : > { %p765_p0 = por %p764_p13, %p763_p12 }
   0xf   : > { %p746_p8 = pneg %p928_p7 }
  0x11   : > { %p758_p10 = pnand %p756_p9, %p746_p8 }
  0x13   : > { %p759_p11 = pneg %p758_p10 }
  0x15   : > { %p766_p2 = pnand %p765_p0, %p759_p11 }
  0x17   : > { %769 = shalt.err (!%p766_p2)
}
  0x18   : > { %s855_s27 = smov 128   ;;  %s856_s28 = smov 8  }
  0x19   : > { %684 = dma.hbm_to_vmem [thread:$0]  (!%p928_p7), %s1025_s1, 512, %s179_s23, [#allocation5], %s855_s27, %s855_s27, %s856_s28  }
  0x1a   : > { %p45_p3 = scmp.ge.s32.totalorder %s43_s25, 2  ;;  %s54_s4 = sadd.s32 1, %s840_s14 }
  0x1b   : > { %p61_p6 = scmp.ne.s32.totalorder %s840_s14, %s836_s13  ;;  %p62_p8 = scmp.eq.s32.totalorder %s852_s17, 0 }
  0x1c   : > { %s1039_s25 = smov (%p45_p3, %s43_s25), 0  ;;  %p690_p10 = scmp.lt.s32.totalorder %s852_s17, 2 }
  0x1d   : > { %p63_p9 = por %p62_p8, %p61_p6  ;;  %s47_s5 = ssub.s32 %s848_s16, %s1039_s25 }
  0x1e   : > { %s198_s6 = sand.u32 1, %s840_s14   ;;  %p52_p11 = scmp.eq.s32.totalorder %s47_s5, 0 }
  0x1f   : > { %s614_s7 = sshll.u32 %s198_s6, 5  ;;  %s633_s8 = sshll.u32 %s848_s16, 9 }
  0x20   : > { %s955_s9 = scalar_select %p52_p11, %s840_s14, %s54_s4  }
  0x21   : > { %s211_s12 = scalar_lea.hbm %s1024_s0, %s633_s8  ;;  %s202_s18 = scalar_lea.vmem [#allocation2], %s614_s7 }
  0x22   : > { %s212_s22 = sshll.u32 %s202_s18, 4  ;;  %p960_p7 = pnand %p690_p10, %p63_p9  ;;  %s213_s22 = int_to_ptr.vmem [resolvable:$true] %s212_s22 }
  0x23   : > { %s199_s24 = scalar_lea.sflag [#allocation3], %s198_s6  ;;  %s783_s26 = scalar_lea.vmem %s213_s22, 512 }
  0x24   : > { %p772_p12 = pneg %p960_p7  ;;  %p784_p13 = scmp.ne.s32.totalorder %s213_s22, %s783_s26 }
  0x25   : > { %s857_s29 = smov [#allocation2]  }
  0x26   : > { %p786_p0 = pnand %p784_p13, %p772_p12  ;;  %s788_s30 = sshll.u32 %s857_s29, 4  ;;  %s789_s30 = int_to_ptr.vmem [resolvable:$false] %s788_s30 }
  0x27   : > { %s790_s4 = scalar_lea.vmem %s789_s30, 1024  ;;  %p791_p3 = scmp.lt.s32.totalorder %s213_s22, %s789_s30 }
  0x28   : > { %p787_p2 = pneg %p786_p0  ;;  %p792_p6 = scmp.lt.s32.totalorder %s790_s4, %s783_s26 }
  0x2a   : > { %p793_p8 = por %p792_p6, %p791_p3 }
  0x2c   : > { %p794_p9 = pnand %p793_p8, %p787_p2 }
  0x2e   : > { %797 = shalt.err (!%p794_p9)
}
  0x2f   : > { %688 = dma.hbm_to_vmem [thread:$0]  (!%p960_p7), %s211_s12, 512, %s213_s22, %s199_s24, %s855_s27, %s855_s27, %s856_s28  }
  0x30   : > { %224 = sbr.rel (%p920_p5) target bundleno = 408 (0x198), region = 32  ;;  %s226_s5 = sand.u32 (!%p920_p5), 1, %s836_s13  }
  0x31   : > { %s618_s6 = sshll.u32 (!%p920_p5), %s226_s5, 5  ;;  %s227_s7 = scalar_lea.sflag (!%p920_p5), [#allocation3], %s226_s5 }
  0x32   : > { %s230_s8 = scalar_lea.vmem (!%p920_p5), [#allocation2], %s618_s6 }
  0x35   : > { %823 = dma.done.wait (%p916_p4), %s227_s7, 512  }
  0x36   : > { %825 = vsyncadd (%p916_p4), %s227_s7, 4294966784 }
  0x37   : > { %827 = dma.done.wait (%p908_p1), [#allocation5], 512  }
  0x38   : > { %829 = vsyncadd (%p908_p1), [#allocation5], 4294966784  ;;  %v285_v0 = vld [vmem:[%s230_s8] sm:$0xff]  ;;  %v292_v1 = vld [vmem:[#allocation4 + $0x18] sm:$0xff]  ;;  %vm332_vm0 = vcmask 261120   ;;  %p273_p1 = scmp.lt.s32.totalorder %s844_s15, 1 }
  0x39   : > { %300 = vxpose.xlu0.b32.start [1/4] (short) (narrow) %v285_v0, 64  ;;  %v291_v2 = vld [vmem:[#allocation4 + $0x10] sm:$0xff]  ;;  %v286_v3 = vld [vmem:[%s230_s8 + $0x8] sm:$0xff]  ;;  %647 = vmatprep.subr.mxu0 %v292_v1  ;;  %v289_v5 = vld [vmem:[#allocation4] sm:$0xff] }
  0x3a   : > { %667 = vmatprep.subr.mxu1 %v292_v1  ;;  %648 = vmatpush3.msra.mxu0 %v292_v1  ;;  %v290_v4 = vld [vmem:[#allocation4 + $0x8] sm:$0xff]  ;;  %v287_v6 = vld [vmem:[%s230_s8 + $0x10] sm:$0xff]  ;;  %v288_v7 = vld [vmem:[%s230_s8 + $0x18] sm:$0xff]  ;;  %s1041_s15 = smov (!%p273_p1, %s844_s15), 1 }
  0x3b   : > { %671 = vmatpush3.msra.mxu1 %v292_v1  ;;  %649 = vmatprep.subr.mxu0 %v291_v2  ;;  %s634_s19 = sshll.u32 %s1041_s15, 6  ;;  %v622_v16 = vld [vmem:[%s1026_s2] ss:$0 sm:$0xff] }
  0x3c   : > { %668 = vmatprep.subr.mxu1 %v291_v2  ;;  %650 = vmatpush3.msra.mxu0 %v291_v2  ;;  %s283_s10 = scalar_lea.vmem %s1027_s3, %s634_s19 }
  0x3d   : > { %301 = vxpose.xlu0.b32.cont [2/4] (short) (narrow) %v286_v3, 64  ;;  %651 = vmatprep.subr.mxu0 %v290_v4 }
  0x3e   : > { %672 = vmatpush3.msra.mxu1 %v291_v2  ;;  %652 = vmatpush3.msra.mxu0 %v290_v4 }
  0x3f   : > { %669 = vmatprep.subr.mxu1 %v290_v4  ;;  %653 = vmatprep.subr.mxu0 %v289_v5 }
  0x40   : > { %673 = vmatpush3.msra.mxu1 %v290_v4  ;;  %654 = vmatpush3.msra.mxu0 %v289_v5 }
  0x41   : > { %302 = vxpose.xlu0.b32.cont [3/4] (short) (narrow) %v287_v6, 64  ;;  %670 = vmatprep.subr.mxu1 %v289_v5 }
  0x42   : > { %674 = vmatpush3.msra.mxu1 %v289_v5 }
  0x45   : > { %303 = vxpose.xlu0.b32.end [4/4] (short) (narrow) %v288_v7, 64 }
  0xb5   : > { %v316_v8 = vpop.trf.xlu0 }
  0xb6   : > { %655 = vmatprep.mubr.msk.f32.mxu0 %vm332_vm0, %v316_v8 }
  0xb9   : > { %v317_v9 = vpop.trf.xlu0 }
  0xba   : > { %656 = vmatmul.mubr.msk.f32.vlgmr.msra.gmra.mxu0 %vm332_vm0, %v317_v9 }
  0xbd   : > { %v318_v10 = vpop.trf.xlu0 }
  0xbe   : > { %658 = vmatprep.mubr.msk.f32.mxu0 %vm332_vm0, %v318_v10 }
  0xc1   : > { %v319_v11 = vpop.trf.xlu0 }
  0xc2   : > { %659 = vmatmul.mubr.msk.f32.gmra.mxu0 %vm332_vm0, %v319_v11 }
  0xc5   : > { %v320_v12 = vpop.trf.xlu0 }
  0xc6   : > { %661 = vmatprep.mubr.msk.f32.mxu1 %vm332_vm0, %v320_v12 }
  0xc9   : > { %v321_v13 = vpop.trf.xlu0 }
  0xca   : > { %662 = vmatmul.mubr.msk.f32.vlgmr.msra.gmra.mxu1 %vm332_vm0, %v321_v13 }
  0xcd   : > { %v322_v14 = vpop.trf.xlu0 }
  0xce   : > { %664 = vmatprep.mubr.msk.f32.mxu1 %vm332_vm0, %v322_v14 }
  0xd1   : > { %v323_v15 = vpop.trf.xlu0 }
  0xd2   : > { %665 = vmatmul.mubr.msk.f32.gmra.mxu1 %vm332_vm0, %v323_v15 }
 0x17a   : > { %v657_v17 = vpop.f32.mrf.mxu0 }
 0x17b   : > { %v429_v18 = vadd.f32 %v657_v17, %v622_v16 }
 0x17c   : > { %v423_v19 = vpop.f32.mrf.mxu0 }
 0x17d   : > { %463 = vst.msk [vmem:[%s283_s10 + $0x8] sm:$0xff] %vm332_vm0, %v429_v18  ;;  %v424_v20 = vadd.f32 %v622_v16, %v423_v19 }
 0x17f   : > { %462 = vst.msk [vmem:[%s283_s10] sm:$0xff] %vm332_vm0, %v424_v20 }
 0x182   : > { %v660_v21 = vpop.f32.mrf.mxu0 }
 0x183   : > { %v439_v22 = vadd.f32 %v660_v21, %v622_v16 }
 0x184   : > { %v433_v23 = vpop.f32.mrf.mxu0 }
 0x185   : > { %465 = vst.msk [vmem:[%s283_s10 + $0x18] sm:$0xff] %vm332_vm0, %v439_v22  ;;  %v434_v24 = vadd.f32 %v622_v16, %v433_v23 }
 0x187   : > { %464 = vst.msk [vmem:[%s283_s10 + $0x10] sm:$0xff] %vm332_vm0, %v434_v24 }
 0x18a   : > { %v663_v25 = vpop.f32.mrf.mxu1 }
 0x18b   : > { %v449_v26 = vadd.f32 %v663_v25, %v622_v16 }
 0x18c   : > { %v443_v27 = vpop.f32.mrf.mxu1 }
 0x18d   : > { %467 = vst.msk [vmem:[%s283_s10 + $0x28] sm:$0xff] %vm332_vm0, %v449_v26  ;;  %v444_v28 = vadd.f32 %v622_v16, %v443_v27 }
 0x18f   : > { %466 = vst.msk [vmem:[%s283_s10 + $0x20] sm:$0xff] %vm332_vm0, %v444_v28 }
 0x192   : > { %v666_v29 = vpop.f32.mrf.mxu1 }
 0x193   : > { %v459_v30 = vadd.f32 %v666_v29, %v622_v16 }
 0x194   : > { %v453_v31 = vpop.f32.mrf.mxu1 }
 0x195   : > { %469 = vst.msk [vmem:[%s283_s10 + $0x38] sm:$0xff] %vm332_vm0, %v459_v30  ;;  %v454_v32 = vadd.f32 %v622_v16, %v453_v31 }
 0x197   : > { %468 = vst.msk [vmem:[%s283_s10 + $0x30] sm:$0xff] %vm332_vm0, %v454_v32 }
 0x198 PF: > { %s17_s17 = sadd.s32 1, %s852_s17   ;;  %s1033_s12 = smov %s836_s13 }
 0x199   : > { %p14_p4 = scmp.ge.s32.totalorder %s17_s17, 4   ;;  %s1034_s13 = smov %s840_s14 }
 0x19a   : > { %s1035_s14 = smov %s955_s9  ;;  %s1036_s15 = smov %s848_s16 }
 0x19b   : > { %s1037_s16 = smov %s1039_s25  ;;  %16 = sbr.rel (!%p14_p4) target bundleno = 5 (0x5), region = 80 }
 0x1a0   :  { %506 = vsyncpa [#allocation3], 1 }
 0x1a1   :  { %508 = vsyncpa [#allocation3 + $0x1], 1 }
 0x1a2   :  { %509 = vsyncpa [#allocation5], 1 }

</bundles_post_ra>
